<compile_context>
chip_gen: v7x
topology: tpu7x:2x2x1
jax: 0.10.0
libtpu: 0.0.40
codegen_flags: <defaults>
</compile_context>

<pallas_src>
import jax
import jax.numpy as jnp
from jax.experimental import pallas as pl
from jax.experimental.pallas import tpu as pltpu


_MXU_PRODUCT_THRESHOLD = 256        # use MXU when Cin*Cout exceeds this
_MAX_TM_MXU = 4096                  # lane-tile upper bound (MXU path)
_MAX_TM_VPU = 2048                  # lane-tile upper bound (VPU path, pre vreg cap)
_VPU_ACC_BYTES = 96 * 1024          # keep Cout*TM*4 f32 accumulator in vregs
_VMEM_HEADROOM = 4 * 1024 * 1024    # leave room for Mosaic internal scratch


def _vmem_limit_bytes():
    """Generation-aware VMEM limit (explicitly handed to Mosaic)."""
    cap = 64 * 1024 * 1024                       # conservative default (v7x per-TC)
    try:
        info = pltpu.get_tpu_info()
        cap = int(getattr(info, "vmem_capacity_bytes", cap))
    except Exception:
        pass
    # Use at most ~3/4 of physical VMEM, never more than 96 MiB.
    return int(min(cap * 3 // 4, 96 * 1024 * 1024))


def _head_kernel_vpu(x_ref, w_ref, b_ref, o_ref):
    """Tiny Cin*Cout path: unrolled VPU broadcast-FMA, pixels stay on lanes."""
    cout, cin = w_ref.shape
    tm = x_ref.shape[-1]
    x = x_ref[...].astype(jnp.float32)                                # (Cin, TM)
    w = w_ref[...].astype(jnp.float32)                                # (Cout, Cin)
    acc = jnp.broadcast_to(b_ref[...].astype(jnp.float32), (cout, tm))
    for ci in range(cin):                                             # static unroll
        acc = acc + w[:, ci:ci + 1] * x[ci:ci + 1, :]                 # (Cout,1)*(1,TM)
    o_ref[...] = acc.astype(o_ref.dtype)


def _head_kernel_mxu(x_ref, w_ref, b_ref, o_ref):
    """Large-channel path: one MXU matmul, K = Cin, N = pixel lanes."""
    acc = jnp.dot(w_ref[...], x_ref[...], preferred_element_type=jnp.float32)
    o_ref[...] = (acc + b_ref[...].astype(jnp.float32)).astype(o_ref.dtype)


def _pick_tm(n, cin, cout, itemsize, budget, max_tm):
    """Largest lane tile (multiple of 128) keeping double-buffered blocks in VMEM."""
    elem = max(int(itemsize), 4)
    w_bytes = 2 * cout * cin * 4 + 2 * cout * 4          # dbl-buffered weights + bias
    per_col = 2 * (cin + cout) * elem                    # dbl-buffered x + out per lane col
    avail = max(budget - w_bytes, per_col * 128)
    tm = (avail // per_col) // 128 * 128
    tm = int(max(128, min(max_tm, tm)))
    # If the whole extent fits in one tile, use a full-dim block
    # (also handles n not a multiple of 128).
    return n if n <= tm else tm


def _split_half(tm, n):
    """Halve a single full-extent tile (128-aligned) so the lane-tile grid
    axis gets >= 2 steps; no-op when n <= 128 (cannot split lane-dense)."""
    if n <= tm and n > 128:
        return max(128, (((n + 1) // 2) + 127) // 128 * 128)
    return tm


def head_forward(x_nchw, weight, bias):
    """Equivalent of Head.forward: 1x1 conv with bias.

    x_nchw: (B, Cin, H, W)
    weight: (Cout, Cin, 1, 1)   (PyTorch Conv2d layout)
    bias:   (Cout,)
    returns (B, Cout, H, W)
    """
    B, Cin, H, W = x_nchw.shape
    Cout = weight.shape[0]
    HW = H * W

    w2 = weight.reshape(Cout, Cin)
    b2 = bias.reshape(Cout, 1)

    use_mxu = (Cin * Cout > _MXU_PRODUCT_THRESHOLD) or (Cin > 32)
    kernel = _head_kernel_mxu if use_mxu else _head_kernel_vpu

    vmem_limit = _vmem_limit_bytes()
    budget = max(vmem_limit - _VMEM_HEADROOM, 8 * 1024 * 1024)
    if use_mxu:
        max_tm = _MAX_TM_MXU
    else:
        # Cap TM so the f32 accumulator (Cout*TM*4 bytes) stays in vregs.
        max_tm = max(128, min(_MAX_TM_VPU, (_VPU_ACC_BYTES // (4 * Cout)) // 128 * 128))

    compiler_params = pltpu.CompilerParams(
        dimension_semantics=("parallel", "parallel"),
        vmem_limit_bytes=vmem_limit,
    )
    itemsize = x_nchw.dtype.itemsize

    if HW < 128:
        # Small feature maps (7x7 / 8x8 heads): fold batch into the lane axis so
        # the output's trailing dim is B*HW -> lane-dense stores.
        N = B * HW
        x2 = jnp.transpose(x_nchw.reshape(B, Cin, HW), (1, 0, 2)).reshape(Cin, N)

        tm = _pick_tm(N, Cin, Cout, itemsize, budget, max_tm)
        tco = Cout
        if pl.cdiv(N, tm) < 2:
            new_tm = _split_half(tm, N)
            if new_tm != tm:
                tm = new_tm
            elif Cout > 8:
                # Cannot split lanes -> split Cout so both TensorCores get work.
                tco = max(8, (((Cout + 1) // 2) + 7) // 8 * 8)
        grid = (pl.cdiv(Cout, tco), pl.cdiv(N, tm))

        out2 = pl.pallas_call(
            kernel,
            out_shape=jax.ShapeDtypeStruct((Cout, N), x_nchw.dtype),
            grid_spec=pltpu.PrefetchScalarGridSpec(
                num_scalar_prefetch=0,
                grid=grid,
                in_specs=[
                    pl.BlockSpec((Cin, tm), lambda co, m: (0, m)),
                    pl.BlockSpec((tco, Cin), lambda co, m: (co, 0)),
                    pl.BlockSpec((tco, 1), lambda co, m: (co, 0)),
                ],
                out_specs=pl.BlockSpec((tco, tm), lambda co, m: (co, m)),
            ),
            compiler_params=compiler_params,
        )(x2, w2, b2)

        return jnp.transpose(out2.reshape(Cout, B, HW), (1, 0, 2)).reshape(B, Cout, H, W)

    # General path: keep NCHW, collapse H,W only (no transpose / extra HBM pass).
    x3 = x_nchw.reshape(B, Cin, HW)
    tm = _pick_tm(HW, Cin, Cout, itemsize, budget, max_tm)
    if B * pl.cdiv(HW, tm) < 2:
        tm = _split_half(tm, HW)       # guarantee >=2 parallel steps when possible
    grid = (B, pl.cdiv(HW, tm))

    out3 = pl.pallas_call(
        kernel,
        out_shape=jax.ShapeDtypeStruct((B, Cout, HW), x_nchw.dtype),
        grid_spec=pltpu.PrefetchScalarGridSpec(
            num_scalar_prefetch=0,
            grid=grid,
            in_specs=[
                pl.BlockSpec((None, Cin, tm), lambda b, m: (b, 0, m)),
                pl.BlockSpec((Cout, Cin), lambda b, m: (0, 0)),
                pl.BlockSpec((Cout, 1), lambda b, m: (0, 0)),
            ],
            out_specs=pl.BlockSpec((None, Cout, tm), lambda b, m: (b, 0, m)),
        ),
        compiler_params=compiler_params,
    )(x3, w2, b2)

    return out3.reshape(B, Cout, H, W)


if __name__ == "__main__":
    key = jax.random.PRNGKey(0)
    kx, kw, kb = jax.random.split(key, 3)

    # Small shapes consistent with the module's forward (exercises the VPU path,
    # general NCHW layout, grid (B, m-tiles)).
    B, Cin, H, W = 2, 4, 16, 16
    Cout = 8

    x = jax.random.normal(kx, (B, Cin, H, W), dtype=jnp.float32)
    bound = 1.0 / (Cin ** 0.5)
    weight = jax.random.uniform(kw, (Cout, Cin, 1, 1), jnp.float32, -bound, bound)
    bias = jax.random.uniform(kb, (Cout,), jnp.float32, -bound, bound)

    out = jax.block_until_ready(head_forward(x, weight, bias))
    ref = jnp.einsum("bchw,oc->bohw", x, weight.reshape(Cout, Cin),
                     precision=jax.lax.Precision.HIGHEST) + bias[None, :, None, None]
    assert out.shape == (B, Cout, H, W)
    assert jnp.allclose(out, ref, atol=1e-4, rtol=1e-4)

    # Larger-channel, small-feature-map smoke test
    # (exercises the MXU path + lane-dense (Cin, B*HW) layout + Cout split).
    B2, Cin2, H2, W2, Cout2 = 2, 128, 8, 8, 128
    k2x, k2w, k2b = jax.random.split(jax.random.PRNGKey(1), 3)
    x2 = jax.random.normal(k2x, (B2, Cin2, H2, W2), dtype=jnp.float32)
    w2 = jax.random.normal(k2w, (Cout2, Cin2, 1, 1), dtype=jnp.float32) * 0.05
    b2 = jax.random.normal(k2b, (Cout2,), dtype=jnp.float32)
    out2 = jax.block_until_ready(head_forward(x2, w2, b2))
    ref2 = jnp.einsum("bchw,oc->bohw", x2, w2.reshape(Cout2, Cin2),
                      precision=jax.lax.Precision.HIGHEST) + b2[None, :, None, None]
    assert out2.shape == (B2, Cout2, H2, W2)
    assert jnp.allclose(out2, ref2, atol=1e-2, rtol=1e-2)

    print("KERNEL_OK")
</pallas_src>

<mosaic_0001>
module attributes {stable_mosaic.version = 11 : i64} {
  func.func @_head_kernel_vpu(%arg0: i32, %arg1: i32, %arg2: memref<1x4x256xf32, #tpu.memory_space<vmem>>, %arg3: memref<8x4xf32, #tpu.memory_space<vmem>>, %arg4: memref<8x1xf32, #tpu.memory_space<vmem>>, %arg5: memref<1x8x256xf32, #tpu.memory_space<vmem>>) attributes {dimension_semantics = [#tpu.dimension_semantics<parallel>, #tpu.dimension_semantics<parallel>], iteration_bounds = array<i64: 2, 1>, scalar_prefetch = 0 : i64, scratch_operands = 0 : i64, tpu.core_type = #tpu.core_type<tc>, window_params = [{transform_indices = @transform_0, window_bounds = array<i64: 1, 4, 256>}, {pipeline_mode = #tpu.pipeline_mode<synchronous>, transform_indices = @transform_1, window_bounds = array<i64: 8, 4>}, {pipeline_mode = #tpu.pipeline_mode<synchronous>, transform_indices = @transform_2, window_bounds = array<i64: 8, 1>}, {transform_indices = @transform_3, window_bounds = array<i64: 1, 8, 256>}]} {
    %c0 = arith.constant 0 : index
    %c0_0 = arith.constant 0 : index
    %c0_1 = arith.constant 0 : index
    %0 = vector.load %arg2[%c0, %c0_0, %c0_1] : memref<1x4x256xf32, #tpu.memory_space<vmem>>, vector<1x4x256xf32>
    %1 = vector.shape_cast %0 : vector<1x4x256xf32> to vector<4x256xf32>
    %c0_2 = arith.constant 0 : index
    %c0_3 = arith.constant 0 : index
    %2 = vector.load %arg3[%c0_2, %c0_3] : memref<8x4xf32, #tpu.memory_space<vmem>>, vector<8x4xf32>
    %c0_4 = arith.constant 0 : index
    %c0_5 = arith.constant 0 : index
    %3 = vector.load %arg4[%c0_4, %c0_5] : memref<8x1xf32, #tpu.memory_space<vmem>>, vector<8x1xf32>
    %4 = vector.shape_cast %3 : vector<8x1xf32> to vector<8x1xf32>
    %5 = vector.broadcast %4 : vector<8x1xf32> to vector<8x256xf32>
    %6 = vector.extract_strided_slice %2 {offsets = [0, 0], sizes = [8, 1], strides = [1, 1]} : vector<8x4xf32> to vector<8x1xf32>
    %7 = vector.extract_strided_slice %1 {offsets = [0, 0], sizes = [1, 256], strides = [1, 1]} : vector<4x256xf32> to vector<1x256xf32>
    %8 = vector.broadcast %6 : vector<8x1xf32> to vector<8x256xf32>
    %9 = vector.broadcast %7 : vector<1x256xf32> to vector<8x256xf32>
    %10 = arith.mulf %8, %9 : vector<8x256xf32>
    %11 = arith.addf %5, %10 : vector<8x256xf32>
    %12 = vector.extract_strided_slice %2 {offsets = [0, 1], sizes = [8, 1], strides = [1, 1]} : vector<8x4xf32> to vector<8x1xf32>
    %13 = vector.extract_strided_slice %1 {offsets = [1, 0], sizes = [1, 256], strides = [1, 1]} : vector<4x256xf32> to vector<1x256xf32>
    %14 = vector.broadcast %12 : vector<8x1xf32> to vector<8x256xf32>
    %15 = vector.broadcast %13 : vector<1x256xf32> to vector<8x256xf32>
    %16 = arith.mulf %14, %15 : vector<8x256xf32>
    %17 = arith.addf %11, %16 : vector<8x256xf32>
    %18 = vector.extract_strided_slice %2 {offsets = [0, 2], sizes = [8, 1], strides = [1, 1]} : vector<8x4xf32> to vector<8x1xf32>
    %19 = vector.extract_strided_slice %1 {offsets = [2, 0], sizes = [1, 256], strides = [1, 1]} : vector<4x256xf32> to vector<1x256xf32>
    %20 = vector.broadcast %18 : vector<8x1xf32> to vector<8x256xf32>
    %21 = vector.broadcast %19 : vector<1x256xf32> to vector<8x256xf32>
    %22 = arith.mulf %20, %21 : vector<8x256xf32>
    %23 = arith.addf %17, %22 : vector<8x256xf32>
    %24 = vector.extract_strided_slice %2 {offsets = [0, 3], sizes = [8, 1], strides = [1, 1]} : vector<8x4xf32> to vector<8x1xf32>
    %25 = vector.extract_strided_slice %1 {offsets = [3, 0], sizes = [1, 256], strides = [1, 1]} : vector<4x256xf32> to vector<1x256xf32>
    %26 = vector.broadcast %24 : vector<8x1xf32> to vector<8x256xf32>
    %27 = vector.broadcast %25 : vector<1x256xf32> to vector<8x256xf32>
    %28 = arith.mulf %26, %27 : vector<8x256xf32>
    %29 = arith.addf %23, %28 : vector<8x256xf32>
    %c0_6 = arith.constant 0 : index
    %c0_7 = arith.constant 0 : index
    %c0_8 = arith.constant 0 : index
    %30 = vector.load %arg5[%c0_6, %c0_7, %c0_8] : memref<1x8x256xf32, #tpu.memory_space<vmem>>, vector<1x8x256xf32>
    %31 = vector.shape_cast %30 : vector<1x8x256xf32> to vector<8x256xf32>
    %32 = vector.shape_cast %29 : vector<8x256xf32> to vector<1x8x256xf32>
    tpu.vector_store %arg5[%c0_6, %c0_7, %c0_8], %32 {strides = array<i32>} : memref<1x8x256xf32, #tpu.memory_space<vmem>>, vector<1x8x256xf32>,
    return
  }
  func.func @transform_0(%arg0: i32, %arg1: i32) -> (i32, i32, i32) {
    %c0_i32 = arith.constant 0 : i32
    %c0_i32_0 = arith.constant 0 : i32
    return %arg0, %c0_i32, %arg1 : i32, i32, i32
  }
  func.func @transform_1(%arg0: i32, %arg1: i32) -> (i32, i32) {
    %c0_i32 = arith.constant 0 : i32
    %c0_i32_0 = arith.constant 0 : i32
    %c0_i32_1 = arith.constant 0 : i32
    return %c0_i32, %c0_i32_0 : i32, i32
  }
  func.func @transform_2(%arg0: i32, %arg1: i32) -> (i32, i32) {
    %c0_i32 = arith.constant 0 : i32
    %c0_i32_0 = arith.constant 0 : i32
    %c0_i32_1 = arith.constant 0 : i32
    return %c0_i32, %c0_i32_0 : i32, i32
  }
  func.func @transform_3(%arg0: i32, %arg1: i32) -> (i32, i32, i32) {
    %c0_i32 = arith.constant 0 : i32
    %c0_i32_0 = arith.constant 0 : i32
    return %arg0, %c0_i32, %arg1 : i32, i32, i32
  }
}

</mosaic_0001>

<bundles_post_ra>
// kernel: tpu_custom_call.1
= control target key start
LH: loop header
LB: loop body
LE: loop exit
PB: predicated region body
PF: predicated region fallthrough
CT: control target
= control target key end

     0   :  { %8 = vsyncpa [#allocation3], 0  ;;  %s714_s0 = inlined_call_operand.vmem [shape: f32[2,4,256], index: 0, kind: input, shape index: {}]   ;;  %s715_s1 = inlined_call_operand.vmem [shape: f32[8,4], index: 1, kind: input, shape index: {}]   ;;  %s716_s2 = inlined_call_operand.vmem [shape: f32[8,1], index: 2, kind: input, shape index: {}]   ;;  %s717_s3 = inlined_call_operand.hbm [shape: f32[2,8,256], index: 3, kind: output, shape index: {}]  }
   0x1   :  { %10 = vsyncpa [#allocation3 + $0x1], 0  ;;  %s592_s12 = smov 0   ;;  %s594_s13 = smov 0  }
   0x2   :  { %s596_s14 = smov 0   ;;  %s598_s15 = smov 0  }
   0x3   :  { %s600_s16 = smov 0   ;;  %s602_s17 = smov 0  }
   0x4 LB: > { %s409_s18 = sadd.s32 4294967295, %s565_s17   ;;  %s410_s19 = sadd.s32 4294967294, %s565_s17   ;;  %s565_s17 = sphi %s602_s17, %s16_s17   ;;  %s561_s16 = sphi %s600_s16, %s724_s16   ;;  %s557_s15 = sphi %s598_s15, %s723_s15   ;;  %s553_s14 = sphi %s596_s14, %s722_s14   ;;  %s549_s13 = sphi %s594_s13, %s721_s13   ;;  %s545_s12 = sphi %s592_s12, %s720_s12  }
   0x5   : > { %s28_s20 = sadd.s32 1, %s561_s16  ;;  %s107_s21 = sadd.s32 1, %s553_s14 }
   0x6   : > { %p30_p0 = scmp.ge.s32.totalorder %s28_s20, 2  ;;  %p117_p1 = scmp.ne.s32.totalorder %s553_s14, %s549_s13 }
   0x7   : > { %p118_p2 = scmp.eq.s32.totalorder %s409_s18, 1  ;;  %p123_p3 = scmp.ne.s32.totalorder %s549_s13, %s545_s12 }
   0x8   : > { %s726_s20 = smov (%p30_p0, %s28_s20), 0  ;;  %p124_p5 = scmp.eq.s32.totalorder %s410_s19, 1 }
   0x9   : > { %p632_p4 = por %p118_p2, %p117_p1  ;;  %s102_s23 = ssub.s32 %s561_s16, %s726_s20 }
   0xa   : > { %p413_p6 = scmp.ge.s32.totalorder %s565_s17, 1  ;;  %p105_p7 = scmp.eq.s32.totalorder %s102_s23, 0 }
   0xb   : > { %p639_p8 = por %p124_p5, %p123_p3  ;;  %p161_p9 = scmp.lt.s32.totalorder %s565_s17, 3 }
   0xc   : > { %s645_s25 = scalar_select %p105_p7, %s553_s14, %s107_s21  }
   0xd   : > { %p162_p10 = pnand %p413_p6, %p161_p9 }
   0xe   : > { %v201_v0 = vld [vmem:[%s715_s1] sm:$0xff] (!%p162_p10)  ;;  %v567_v1 = vmov (!%p162_p10), 0   ;;  %v568_v2 = vmov (!%p162_p10), 1   ;;  %v569_v4 = vmov (!%p162_p10), 2   ;;  %v570_v5 = vmov (!%p162_p10), 3   ;;  %p190_p11 = scmp.lt.s32.totalorder (!%p162_p10), %s557_s15, 1 }
   0xf   : > { %165 = sbr.rel (%p162_p10) target bundleno = 171 (0xab), region = 32  ;;  %483 = vset.pattern.permute.xlu0 (!%p162_p10), %v567_v1  ;;  %484 = vset.pattern.permute.xlu1 (!%p162_p10), %v568_v2  ;;  %v202_v3 = vld [vmem:[%s716_s2] sm:$0xff] (!%p162_p10)  ;;  %v214_v6 = vlaneseq (!%p162_p10)  ;;  %s186_s8 = sand.u32 (!%p162_p10), 1, %s549_s13  }
  0x10   : > { %210 = vperm.xlu0 (!%p162_p10), %483, %v201_v0   ;;  %237 = vperm.xlu1 (!%p162_p10), %484, %v201_v0   ;;  %s414_s9 = sshll.u32 (!%p162_p10), %s186_s8, 4  ;;  %s423_s10 = sshll.u32 (!%p162_p10), %s557_s15, 8 }
  0x11   : > { %v215_v7 = vshrl.u32 (!%p162_p10), %v214_v6, 7  ;;  %s188_s11 = scalar_lea.vmem (!%p162_p10), [#allocation2], %s414_s9  ;;  %s665_s23 = scalar_lea.hbm (!%p162_p10), %s717_s3, %s423_s10 }
  0x12   : > { %s333_s18 = sshll.u32 (!%p162_p10), %s188_s11, 4  ;;  %s571_s27 = smov (!%p162_p10), [#allocation2]   ;;  %s667_s18 = int_to_ptr.vmem [resolvable:$true] %s333_s18 }
  0x13   : > { %v216_v8 = vsub.s32 (!%p162_p10), 0, %v215_v7  ;;  %v220_v9 = vsub.s32 (!%p162_p10), 4, %v215_v7  ;;  %v242_v11 = vsub.s32 (!%p162_p10), 1, %v215_v7  ;;  %v246_v12 = vsub.s32 (!%p162_p10), 5, %v215_v7  ;;  %s487_s26 = scalar_lea.vmem (!%p162_p10), %s667_s18, 256  ;;  %s491_s28 = sshll.u32 (!%p162_p10), %s571_s27, 4  ;;  %s492_s28 = int_to_ptr.vmem [resolvable:$false] %s491_s28 }
  0x14   : > { %205 = vperm.xlu0 (!%p162_p10), %483, %v202_v3   ;;  %485 = vset.pattern.permute.xlu1 (!%p162_p10), %v569_v4  ;;  %v268_v13 = vsub.s32 (!%p162_p10), 2, %v215_v7  ;;  %v272_v14 = vsub.s32 (!%p162_p10), 6, %v215_v7  ;;  %v294_v21 = vsub.s32 (!%p162_p10), 3, %v215_v7  ;;  %v298_v22 = vsub.s32 (!%p162_p10), 7, %v215_v7  ;;  %p488_p12 = scmp.ne.s32.totalorder (!%p162_p10), %s667_s18, %s487_s26  ;;  %s493_s29 = scalar_lea.vmem (!%p162_p10), %s492_s28, 512 }
  0x15   : > { %263 = vperm.xlu1 (!%p162_p10), %485, %v201_v0   ;;  %p494_p1 = scmp.lt.s32.totalorder (!%p162_p10), %s667_s18, %s492_s28  ;;  %p495_p2 = scmp.lt.s32.totalorder (!%p162_p10), %s493_s29, %s487_s26 }
  0x16   : > { %s191_s30 = scalar_select %p190_p11, %s557_s15, 1 }
  0x17   : > { %s317_s15 = scalar_lea.sflag [#allocation3], %s186_s8  ;;  %p489_p13 = pnand %p488_p12, %p632_p4 }
  0x18   : > { %486 = vset.pattern.permute.xlu0 %v570_v5  ;;  %s422_s4 = sshll.u32 %s191_s30, 3  ;;  %p496_p3 = por %p495_p2, %p494_p1 }
  0x19   : > { %289 = vperm.xlu0 %486, %v201_v0   ;;  %s197_s7 = scalar_lea.vmem %s714_s0, %s422_s4  ;;  %p490_p0 = pneg %p489_p13 }
  0x1a   : > { %v200_v10 = vld [vmem:[%s197_s7] sm:$0xff] }
  0x1b   : > { %v217_v15 = vrot.slane %v200_v10, %v216_v8  ;;  %v221_v16 = vrot.slane %v200_v10, %v220_v9  ;;  %v243_v17 = vrot.slane %v200_v10, %v242_v11  ;;  %v247_v18 = vrot.slane %v200_v10, %v246_v12  ;;  %p497_p5 = pnand %p496_p3, %p490_p0 }
  0x1c   : > { %v269_v19 = vrot.slane %v200_v10, %v268_v13  ;;  %v273_v20 = vrot.slane %v200_v10, %v272_v14  ;;  %v295_v31 = vrot.slane %v200_v10, %v294_v21  ;;  %v299_v32 = vrot.slane %v200_v10, %v298_v22 }
  0x1d   : > { %v227_v23 = vrot.slane %v217_v15, %v216_v8  ;;  %v231_v24 = vrot.slane %v221_v16, %v216_v8  ;;  %v253_v27 = vrot.slane %v243_v17, %v242_v11  ;;  %v257_v28 = vrot.slane %v247_v18, %v242_v11 }
  0x1e   : > { %v279_v29 = vrot.slane %v269_v19, %v268_v13  ;;  %v283_v30 = vrot.slane %v273_v20, %v268_v13  ;;  %v305_v43 = vrot.slane %v295_v31, %v294_v21  ;;  %v309_v44 = vrot.slane %v299_v32, %v294_v21 }
  0x8f   : > { %v211_v25 = vpop.permute.xlu0 %210  ;;  %v238_v26 = vpop.permute.xlu1 %237 }
  0x90   : > { %v232_v33 = vmul.f32 %v227_v23, %v211_v25  ;;  %v233_v34 = vmul.f32 %v231_v24, %v211_v25  ;;  %v258_v36 = vmul.f32 %v253_v27, %v238_v26  ;;  %v259_v37 = vmul.f32 %v257_v28, %v238_v26 }
  0x93   : > { %v206_v35 = vpop.permute.xlu0 %205 }
  0x94   : > { %v234_v38 = vadd.f32 %v232_v33, %v206_v35  ;;  %v235_v39 = vadd.f32 %v233_v34, %v206_v35  ;;  %v264_v40 = vpop.permute.xlu1 %263 }
  0x95   : > { %v284_v41 = vmul.f32 %v279_v29, %v264_v40  ;;  %v285_v42 = vmul.f32 %v283_v30, %v264_v40 }
  0x96   : > { %v260_v45 = vadd.f32 %v258_v36, %v234_v38  ;;  %v261_v46 = vadd.f32 %v259_v37, %v235_v39 }
  0x98   : > { %v286_v47 = vadd.f32 %v284_v41, %v260_v45  ;;  %v287_v48 = vadd.f32 %v285_v42, %v261_v46  ;;  %v290_v49 = vpop.permute.xlu0 %289 }
  0x99   : > { %v310_v50 = vmul.f32 %v305_v43, %v290_v49  ;;  %v311_v51 = vmul.f32 %v309_v44, %v290_v49 }
  0x9b   : > { %v312_v52 = vadd.f32 %v310_v50, %v286_v47  ;;  %v313_v53 = vadd.f32 %v311_v51, %v287_v48 }
  0x9d   : > { %314 = vst [vmem:[%s188_s11] sm:$0xff] %v312_v52  ;;  %315 = vst [vmem:[%s188_s11 + $0x8] sm:$0xff] %v313_v53 }
  0x9e   : > { %500 = shalt.err (!%p497_p5)
}
  0x9f   : > { %s501_s30 = scalar_lea.hbm %s665_s23, 256  ;;  %s505_s6 = scalar_lea.hbm %s717_s3, 512 }
  0xa0   : > { %p502_p6 = scmp.ne.s32.totalorder %s665_s23, %s501_s30  ;;  %p506_p10 = scmp.lt.u32.totalorder %s665_s23, %s717_s3 }
  0xa1   : > { %p507_p11 = scmp.lt.u32.totalorder %s505_s6, %s501_s30  ;;  %p509_p13 = scmp.lt.u32.totalorder %s501_s30, %s665_s23 }
  0xa2   : > { %p503_p7 = pnand %p502_p6, %p632_p4 }
  0xa3   : > { %p508_p12 = por %p507_p11, %p506_p10 }
  0xa4   : > { %p504_p9 = pneg %p503_p7 }
  0xa5   : > { %p510_p0 = por %p509_p13, %p508_p12 }
  0xa7   : > { %p511_p1 = pnand %p510_p0, %p504_p9 }
  0xa9   : > { %514 = shalt.err (!%p511_p1)
}
  0xaa   : > { %424 = dma.vmem_to_hbm [thread:$0]  (%p632_p4), %s667_s18, 256, %s665_s23, %s317_s15  }
  0xab PF: > { %p430_p2 = scmp.ge.s32.totalorder %s565_s17, 2  ;;  %s345_s9 = sand.u32 1, %s545_s12  }
  0xac   : > { %s346_s10 = scalar_lea.sflag [#allocation3], %s345_s9 }
  0xad   : > { %p427_p3 = pnand %p430_p2, %p639_p8 }
  0xaf   : > { %540 = dma.done.wait (!%p427_p3), %s346_s10, 256  }
  0xb0   : > { %542 = vsyncadd (!%p427_p3), %s346_s10, 4294967040  ;;  %s16_s17 = sadd.s32 1, %s565_s17   ;;  %s720_s12 = smov %s549_s13 }
  0xb1   : > { %p13_p5 = scmp.ge.s32.totalorder %s16_s17, 4   ;;  %s721_s13 = smov %s553_s14 }
  0xb2   : > { %s722_s14 = smov %s645_s25  ;;  %s723_s15 = smov %s561_s16 }
  0xb3   : > { %s724_s16 = smov %s726_s20  ;;  %15 = sbr.rel (!%p13_p5) target bundleno = 4 (0x4), region = 67 }
  0xba   :  { %351 = vsyncpa [#allocation3], 1 }
  0xbb   :  { %353 = vsyncpa [#allocation3 + $0x1], 1 }

</bundles_post_ra>
